<compile_context>
chip_gen: v7x
topology: tpu7x:2x2x1
jax: 0.10.0
libtpu: 0.0.40
codegen_flags: <defaults>
</compile_context>

<pallas_src>
import numpy as np
import jax
import jax.numpy as jnp
from jax.experimental import pallas as pl
from jax.experimental.pallas import tpu as pltpu

SUBLANE_BF16 = 16   # bf16 packs 16 sublanes per vreg; keep batch tiles a multiple of this


def _round_up(n, m):
    return ((n + m - 1) // m) * m


def encoder_kernel(x_ref, w1_ref, b1_ref, w2_ref, b2_ref, wh_ref, bh_ref, out_ref):
    """Fused 2-hidden-layer tanh MLP + fused (mean|logvar) head.

    x_ref   : (TB, X_dim)      f32 (original dtype; cast to bf16 in-kernel)
    w*_ref  : (in, out)        bf16 (VMEM-resident across batch tiles)
    b*_ref  : (1, out)         f32
    out_ref : (TB, 2*Z_dim)    f32  cols [0:Z)=mean, [Z:2Z)=logvar
    """
    # in-kernel cast (free under DMA/MXU slack; saves a wrapper-side HBM pass)
    x = x_ref[...].astype(jnp.bfloat16)
    # hidden 1: bf16 MXU matmul, f32 accumulate, f32 bias-add + tanh (EUP)
    h = jnp.tanh(
        jnp.dot(x, w1_ref[...], preferred_element_type=jnp.float32) + b1_ref[...]
    )
    # hidden 2
    h = jnp.tanh(
        jnp.dot(h.astype(jnp.bfloat16), w2_ref[...],
                preferred_element_type=jnp.float32) + b2_ref[...]
    )
    # fused mean|logvar head: one matmul, one store (only 2*Z_dim real lanes)
    out_ref[...] = (
        jnp.dot(h.astype(jnp.bfloat16), wh_ref[...],
                preferred_element_type=jnp.float32) + bh_ref[...]
    ).astype(out_ref.dtype)


def init_params(key, X_dim, h_dim, Z_dim):
    """Xavier-style init matching the PyTorch module: W ~ N(0, sqrt(2/(in+out)))."""
    def xavier(k, fan_in, fan_out):
        s = np.sqrt(2.0 / (fan_in + fan_out))
        return jax.random.normal(k, (fan_in, fan_out), dtype=jnp.float32) * s

    k1, k2, k3, k4, kb1, kb2, kbm, kbv = jax.random.split(key, 8)
    return dict(
        w1=xavier(k1, X_dim, h_dim),
        b1=0.01 * jax.random.normal(kb1, (1, h_dim), dtype=jnp.float32),
        w2=xavier(k2, h_dim, h_dim),
        b2=0.01 * jax.random.normal(kb2, (1, h_dim), dtype=jnp.float32),
        wm=xavier(k3, h_dim, Z_dim),
        bm=0.01 * jax.random.normal(kbm, (1, Z_dim), dtype=jnp.float32),
        wv=xavier(k4, h_dim, Z_dim),
        bv=0.01 * jax.random.normal(kbv, (1, Z_dim), dtype=jnp.float32),
    )


def prepare_params(p, Z_dim):
    """One-time operand prep: fuse the two heads (no lane padding), cast weights to bf16."""
    wh = jnp.concatenate([p["wm"], p["wv"]], axis=1)          # (h_dim, 2*Z_dim)
    bh = jnp.concatenate([p["bm"], p["bv"]], axis=1)          # (1, 2*Z_dim)
    return dict(
        w1=p["w1"].astype(jnp.bfloat16), b1=p["b1"],
        w2=p["w2"].astype(jnp.bfloat16), b2=p["b2"],
        wh=wh.astype(jnp.bfloat16), bh=bh,
    )


def _choose_batch_tiling(B, max_batch_tile):
    """Pick TB so last-tile padding is bounded and the grid is even when >1 (megacore)."""
    n_tiles = max(1, -(-B // max_batch_tile))
    if n_tiles > 1 and n_tiles % 2 == 1:
        n_tiles += 1                                   # v7x: even grid shards across 2 TCs
    TB = _round_up(-(-B // n_tiles), SUBLANE_BF16)
    B_pad = _round_up(B, TB)
    return TB, B_pad


def encoder_forward(x, kp, Z_dim, *, max_batch_tile=2048):
    """x: [B, X_dim] float32. kp: prepared params. Returns (mean, logvar)."""
    B, X_dim = x.shape
    h_dim = kp["w1"].shape[1]
    head_out = kp["wh"].shape[1]                       # 2*Z_dim

    TB, B_pad = _choose_batch_tiling(B, max_batch_tile)
    xp = x if B_pad == B else jnp.pad(x, ((0, B_pad - B), (0, 0)))

    grid = (B_pad // TB,)

    in_specs = [
        pl.BlockSpec((TB, X_dim), lambda i: (i, 0)),           # x: tiled over batch
        pl.BlockSpec((X_dim, h_dim), lambda i: (0, 0)),        # w1 (resident)
        pl.BlockSpec((1, h_dim), lambda i: (0, 0)),            # b1
        pl.BlockSpec((h_dim, h_dim), lambda i: (0, 0)),        # w2
        pl.BlockSpec((1, h_dim), lambda i: (0, 0)),            # b2
        pl.BlockSpec((h_dim, head_out), lambda i: (0, 0)),     # fused head W
        pl.BlockSpec((1, head_out), lambda i: (0, 0)),         # fused head b
    ]
    out_specs = pl.BlockSpec((TB, head_out), lambda i: (i, 0))

    flops = 2 * B_pad * (X_dim * h_dim + h_dim * h_dim + h_dim * head_out)
    bytes_accessed = (
        B_pad * X_dim * xp.dtype.itemsize            # x read
        + B_pad * head_out * 4                       # out write (f32)
        + 2 * (X_dim * h_dim + h_dim * h_dim + h_dim * head_out)  # bf16 weights
        + 4 * (2 * h_dim + head_out)                 # f32 biases
    )
    cost = pl.CostEstimate(flops=flops,
                           transcendentals=2 * B_pad * h_dim,
                           bytes_accessed=bytes_accessed)

    out = pl.pallas_call(
        encoder_kernel,
        out_shape=jax.ShapeDtypeStruct((B_pad, head_out), jnp.float32),
        grid=grid,
        in_specs=in_specs,
        out_specs=out_specs,
        compiler_params=pltpu.CompilerParams(
            dimension_semantics=("parallel",)),        # megacore-shardable batch axis
        cost_estimate=cost,
    )(xp, kp["w1"], kp["b1"], kp["w2"], kp["b2"], kp["wh"], kp["bh"])

    mean = out[:B, :Z_dim]
    logvar = out[:B, Z_dim:2 * Z_dim]
    return mean, logvar


def encoder_reference_bf16(x, kp, Z_dim):
    """Pure-JAX reference on the identical bf16-operand / f32-accumulate path."""
    xb = x.astype(jnp.bfloat16)
    h = jnp.tanh(jnp.dot(xb, kp["w1"], preferred_element_type=jnp.float32) + kp["b1"])
    h = jnp.tanh(jnp.dot(h.astype(jnp.bfloat16), kp["w2"],
                         preferred_element_type=jnp.float32) + kp["b2"])
    out = jnp.dot(h.astype(jnp.bfloat16), kp["wh"],
                  preferred_element_type=jnp.float32) + kp["bh"]
    return out[:, :Z_dim], out[:, Z_dim:2 * Z_dim]


def encoder_reference_f32(x, p, Z_dim):
    """Pure-f32 reference matching the original PyTorch Encoder numerics."""
    h = jnp.tanh(jnp.dot(x, p["w1"]) + p["b1"])
    h = jnp.tanh(jnp.dot(h, p["w2"]) + p["b2"])
    return jnp.dot(h, p["wm"]) + p["bm"], jnp.dot(h, p["wv"]) + p["bv"]


if __name__ == "__main__":
    # Shapes consistent with the module: X_dim=(1,8,8) -> prod=64, h_dim=32, Z_dim=16.
    B, X_dim, h_dim, Z_dim = 8, 64, 32, 16

    key = jax.random.PRNGKey(0)
    kx, kparams = jax.random.split(key)
    x = jax.random.normal(kx, (B, X_dim), dtype=jnp.float32)

    raw_params = init_params(kparams, X_dim, h_dim, Z_dim)
    kernel_params = prepare_params(raw_params, Z_dim)

    mean, logvar = encoder_forward(x, kernel_params, Z_dim)
    jax.block_until_ready((mean, logvar))

    # Exact-path check (bf16 operands / f32 accumulate, same as kernel).
    ref_mean, ref_logvar = encoder_reference_bf16(x, kernel_params, Z_dim)
    np.testing.assert_allclose(np.asarray(mean), np.asarray(ref_mean),
                               atol=1e-3, rtol=1e-3)
    np.testing.assert_allclose(np.asarray(logvar), np.asarray(ref_logvar),
                               atol=1e-3, rtol=1e-3)

    # Sanity check vs. the pure-f32 PyTorch-equivalent path (bf16 cast tolerance).
    f32_mean, f32_logvar = encoder_reference_f32(x, raw_params, Z_dim)
    np.testing.assert_allclose(np.asarray(mean), np.asarray(f32_mean),
                               atol=5e-2, rtol=5e-2)
    np.testing.assert_allclose(np.asarray(logvar), np.asarray(f32_logvar),
                               atol=5e-2, rtol=5e-2)

    print("KERNEL_OK")
</pallas_src>

<mosaic_0001>
module attributes {stable_mosaic.version = 11 : i64} {
  func.func @encoder_kernel(%arg0: i32, %arg1: memref<16x64xf32, #tpu.memory_space<vmem>>, %arg2: memref<64x32xbf16, #tpu.memory_space<vmem>>, %arg3: memref<1x32xf32, #tpu.memory_space<vmem>>, %arg4: memref<32x32xbf16, #tpu.memory_space<vmem>>, %arg5: memref<1x32xf32, #tpu.memory_space<vmem>>, %arg6: memref<32x32xbf16, #tpu.memory_space<vmem>>, %arg7: memref<1x32xf32, #tpu.memory_space<vmem>>, %arg8: memref<16x32xf32, #tpu.memory_space<vmem>>) attributes {dimension_semantics = [#tpu.dimension_semantics<parallel>], iteration_bounds = array<i64: 1>, scalar_prefetch = 0 : i64, scratch_operands = 0 : i64, tpu.core_type = #tpu.core_type<tc>, window_params = [{transform_indices = @transform_0, window_bounds = array<i64: 16, 64>}, {pipeline_mode = #tpu.pipeline_mode<synchronous>, transform_indices = @transform_1, window_bounds = array<i64: 64, 32>}, {pipeline_mode = #tpu.pipeline_mode<synchronous>, transform_indices = @transform_2, window_bounds = array<i64: 1, 32>}, {pipeline_mode = #tpu.pipeline_mode<synchronous>, transform_indices = @transform_3, window_bounds = array<i64: 32, 32>}, {pipeline_mode = #tpu.pipeline_mode<synchronous>, transform_indices = @transform_4, window_bounds = array<i64: 1, 32>}, {pipeline_mode = #tpu.pipeline_mode<synchronous>, transform_indices = @transform_5, window_bounds = array<i64: 32, 32>}, {pipeline_mode = #tpu.pipeline_mode<synchronous>, transform_indices = @transform_6, window_bounds = array<i64: 1, 32>}, {transform_indices = @transform_7, window_bounds = array<i64: 16, 32>}]} {
    %c0 = arith.constant 0 : index
    %c0_0 = arith.constant 0 : index
    %0 = vector.load %arg1[%c0, %c0_0] : memref<16x64xf32, #tpu.memory_space<vmem>>, vector<16x64xf32>
    %1 = arith.truncf %0 : vector<16x64xf32> to vector<16x64xbf16>
    %c0_1 = arith.constant 0 : index
    %c0_2 = arith.constant 0 : index
    %2 = vector.load %arg2[%c0_1, %c0_2] : memref<64x32xbf16, #tpu.memory_space<vmem>>, vector<64x32xbf16>
    %cst = arith.constant dense<0.000000e+00> : vector<16x32xf32>
    %3 = tpu.matmul %1, %2, %cst {dimension_numbers = #tpu.dot_dimension_numbers<[1], [0], [0], [1], [0, 0, 1, 1], [], []>} : vector<16x64xbf16>, vector<64x32xbf16>, vector<16x32xf32> -> vector<16x32xf32>
    %c0_3 = arith.constant 0 : index
    %c0_4 = arith.constant 0 : index
    %4 = vector.load %arg3[%c0_3, %c0_4] : memref<1x32xf32, #tpu.memory_space<vmem>>, vector<1x32xf32>
    %5 = vector.broadcast %4 : vector<1x32xf32> to vector<16x32xf32>
    %6 = arith.addf %3, %5 : vector<16x32xf32>
    %7 = math.tanh %6 : vector<16x32xf32>
    %8 = arith.truncf %7 : vector<16x32xf32> to vector<16x32xbf16>
    %c0_5 = arith.constant 0 : index
    %c0_6 = arith.constant 0 : index
    %9 = vector.load %arg4[%c0_5, %c0_6] : memref<32x32xbf16, #tpu.memory_space<vmem>>, vector<32x32xbf16>
    %cst_7 = arith.constant dense<0.000000e+00> : vector<16x32xf32>
    %10 = tpu.matmul %8, %9, %cst_7 {dimension_numbers = #tpu.dot_dimension_numbers<[1], [0], [0], [1], [0, 0, 1, 1], [], []>} : vector<16x32xbf16>, vector<32x32xbf16>, vector<16x32xf32> -> vector<16x32xf32>
    %c0_8 = arith.constant 0 : index
    %c0_9 = arith.constant 0 : index
    %11 = vector.load %arg5[%c0_8, %c0_9] : memref<1x32xf32, #tpu.memory_space<vmem>>, vector<1x32xf32>
    %12 = vector.broadcast %11 : vector<1x32xf32> to vector<16x32xf32>
    %13 = arith.addf %10, %12 : vector<16x32xf32>
    %14 = math.tanh %13 : vector<16x32xf32>
    %15 = arith.truncf %14 : vector<16x32xf32> to vector<16x32xbf16>
    %c0_10 = arith.constant 0 : index
    %c0_11 = arith.constant 0 : index
    %16 = vector.load %arg6[%c0_10, %c0_11] : memref<32x32xbf16, #tpu.memory_space<vmem>>, vector<32x32xbf16>
    %cst_12 = arith.constant dense<0.000000e+00> : vector<16x32xf32>
    %17 = tpu.matmul %15, %16, %cst_12 {dimension_numbers = #tpu.dot_dimension_numbers<[1], [0], [0], [1], [0, 0, 1, 1], [], []>} : vector<16x32xbf16>, vector<32x32xbf16>, vector<16x32xf32> -> vector<16x32xf32>
    %c0_13 = arith.constant 0 : index
    %c0_14 = arith.constant 0 : index
    %18 = vector.load %arg7[%c0_13, %c0_14] : memref<1x32xf32, #tpu.memory_space<vmem>>, vector<1x32xf32>
    %19 = vector.broadcast %18 : vector<1x32xf32> to vector<16x32xf32>
    %20 = arith.addf %17, %19 : vector<16x32xf32>
    %c0_15 = arith.constant 0 : index
    %c0_16 = arith.constant 0 : index
    %21 = vector.load %arg8[%c0_15, %c0_16] : memref<16x32xf32, #tpu.memory_space<vmem>>, vector<16x32xf32>
    tpu.vector_store %arg8[%c0_15, %c0_16], %20 {strides = array<i32>} : memref<16x32xf32, #tpu.memory_space<vmem>>, vector<16x32xf32>,
    return
  }
  func.func @transform_0(%arg0: i32) -> (i32, i32) {
    %c0_i32 = arith.constant 0 : i32
    %c0_i32_0 = arith.constant 0 : i32
    return %arg0, %c0_i32 : i32, i32
  }
  func.func @transform_1(%arg0: i32) -> (i32, i32) {
    %c0_i32 = arith.constant 0 : i32
    %c0_i32_0 = arith.constant 0 : i32
    %c0_i32_1 = arith.constant 0 : i32
    return %c0_i32, %c0_i32_0 : i32, i32
  }
  func.func @transform_2(%arg0: i32) -> (i32, i32) {
    %c0_i32 = arith.constant 0 : i32
    %c0_i32_0 = arith.constant 0 : i32
    %c0_i32_1 = arith.constant 0 : i32
    return %c0_i32, %c0_i32_0 : i32, i32
  }
  func.func @transform_3(%arg0: i32) -> (i32, i32) {
    %c0_i32 = arith.constant 0 : i32
    %c0_i32_0 = arith.constant 0 : i32
    %c0_i32_1 = arith.constant 0 : i32
    return %c0_i32, %c0_i32_0 : i32, i32
  }
  func.func @transform_4(%arg0: i32) -> (i32, i32) {
    %c0_i32 = arith.constant 0 : i32
    %c0_i32_0 = arith.constant 0 : i32
    %c0_i32_1 = arith.constant 0 : i32
    return %c0_i32, %c0_i32_0 : i32, i32
  }
  func.func @transform_5(%arg0: i32) -> (i32, i32) {
    %c0_i32 = arith.constant 0 : i32
    %c0_i32_0 = arith.constant 0 : i32
    %c0_i32_1 = arith.constant 0 : i32
    return %c0_i32, %c0_i32_0 : i32, i32
  }
  func.func @transform_6(%arg0: i32) -> (i32, i32) {
    %c0_i32 = arith.constant 0 : i32
    %c0_i32_0 = arith.constant 0 : i32
    %c0_i32_1 = arith.constant 0 : i32
    return %c0_i32, %c0_i32_0 : i32, i32
  }
  func.func @transform_7(%arg0: i32) -> (i32, i32) {
    %c0_i32 = arith.constant 0 : i32
    %c0_i32_0 = arith.constant 0 : i32
    return %arg0, %c0_i32 : i32, i32
  }
}

</mosaic_0001>

<bundles_post_ra>
// kernel: tpu_custom_call.1
= control target key start
LH: loop header
LB: loop body
LE: loop exit
PB: predicated region body
PF: predicated region fallthrough
CT: control target
= control target key end

     0   :  { %v372_v1 = vmov 0.0   ;;  %vm373_vm0 = vmmov 0   ;;  %s475_s0 = inlined_call_operand.vmem [shape: f32[16,64], index: 0, kind: input, shape index: {}]   ;;  %s476_s1 = inlined_call_operand.vmem [shape: bf16[64,32], index: 1, kind: input, shape index: {}]   ;;  %s477_s2 = inlined_call_operand.vmem [shape: f32[1,32], index: 2, kind: input, shape index: {}]   ;;  %s478_s3 = inlined_call_operand.vmem [shape: bf16[32,32], index: 3, kind: input, shape index: {}]   ;;  %s479_s4 = inlined_call_operand.vmem [shape: f32[1,32], index: 4, kind: input, shape index: {}]   ;;  %s480_s5 = inlined_call_operand.vmem [shape: bf16[32,32], index: 5, kind: input, shape index: {}]   ;;  %s481_s6 = inlined_call_operand.vmem [shape: f32[1,32], index: 6, kind: input, shape index: {}]   ;;  %s482_s7 = inlined_call_operand.hbm [shape: f32[16,32], index: 7, kind: output, shape index: {}]  }
   0x1   :  { %v332_v0 = vld [vmem:[%s476_s1] sm:$0xff]   ;;  %299 = vmatprep.subr.bf16.mxu0 %v372_v1  ;;  %311 = vmatprep.subr.bf16.mxu1 %v372_v1  ;;  %v333_v2 = vld [vmem:[%s476_s1 + $0x8] sm:$0xff]   ;;  %v334_v3 = vld [vmem:[%s476_s1 + $0x10] sm:$0xff]  }
   0x2   :  { %300 = vmatpush3.bf16.msra.mxu0 %v332_v0  ;;  %307 = vmatprep.mubr.msk.bf16.mxu0 %vm373_vm0, %v372_v1 }
   0x3   :  { %301 = vmatprep.subr.bf16.mxu0 %v372_v1  ;;  %315 = vmatprep.mubr.msk.bf16.mxu1 %vm373_vm0, %v372_v1 }
   0x6   :  { %302 = vmatpush3.bf16.msra.mxu0 %v333_v2 }
   0x7   :  { %303 = vmatprep.subr.bf16.mxu0 %v372_v1 }
   0x8   :  { %12 = vsyncpa [#allocation3], 0  ;;  %v335_v4 = vld [vmem:[%s476_s1 + $0x18] sm:$0xff]   ;;  %v28_v5 = vld [vmem:[%s475_s0] sm:$0xff]  ;;  %vm70_vm1 = vcmask 523264   ;;  %vm141_vm2 = vcmask 261120  }
   0x9   :  { %v29_v6 = vld [vmem:[%s475_s0 + $0x8] sm:$0xff]  ;;  %v336_v8 = vld [vmem:[%s478_s3] sm:$0xff]   ;;  %s374_s22 = smov [#allocation2]  }
   0xa   :  { %304 = vmatpush3.bf16.msra.mxu0 %v334_v3  ;;  %v30_v7 = vpack.c.bf16 %v29_v6, %v28_v5  ;;  %312 = vmatpush3.bf16.msra.mxu1 %v336_v8  ;;  %v337_v9 = vld [vmem:[%s478_s3 + $0x8] sm:$0xff]   ;;  %v274_v10 = vld [vmem:[%s477_s2] ss:$0 sm:$0xff]  ;;  %s263_s23 = sshll.u32 %s374_s22, 4  ;;  %s264_s23 = int_to_ptr.vmem [resolvable:$true] %s263_s23 }
   0xb   :  { %305 = vmatprep.subr.bf16.mxu0 %v372_v1  ;;  %313 = vmatprep.subr.bf16.mxu1 %v372_v1  ;;  %v338_v20 = vld [vmem:[%s480_s5] sm:$0xff]   ;;  %v339_v21 = vld [vmem:[%s480_s5 + $0x8] sm:$0xff]   ;;  %p353_p1 = scmp.lt.s32.totalorder %s264_s23, %s264_s23 }
   0xc   :  { %v280_v22 = vld [vmem:[%s479_s4] ss:$0 sm:$0xff]  ;;  %s348_s4 = scalar_lea.vmem %s264_s23, 256 }
   0xd   :  { %v284_v32 = vld [vmem:[%s481_s6] ss:$0 sm:$0xff]  ;;  %p349_p0 = scmp.ne.s32.totalorder %s264_s23, %s348_s4  ;;  %p354_p2 = scmp.lt.s32.totalorder %s348_s4, %s348_s4 }
   0xe   :  { %306 = vmatpush3.bf16.msra.mxu0 %v335_v4  ;;  %314 = vmatpush3.bf16.msra.mxu1 %v337_v9 }
   0xf   :  { %319 = vmatprep.subr.bf16.mxu1 %v372_v1  ;;  %p355_p3 = por %p354_p2, %p353_p1 }
  0x11   :  { %308 = vmatmul.mubr.msk.bf16.vlgmr.msra.gmra.mrb[0].mxu0 %vm70_vm1, %v30_v7  ;;  %p356_p4 = pnand %p355_p3, %p349_p0 }
  0xe4   :  { %v108_v11 = vpop.f32.mrb[0].mxu0 }
  0xe5   :  { %v109_v12 = vadd.f32 %v274_v10, %v108_v11  ;;  %v309_v13 = vpop.f32.mrb[1].mxu0 }
  0xe6   :  { %v111_v14 = vpop.f32.mrb[2].mxu0 }
  0xe7   :  { %v112_v15 = vadd.f32 %v274_v10, %v111_v14  ;;  %v310_v16 = vpop.f32.mrb[3].mxu0  ;;  %340 = vtanh.f32 %v109_v12 }
  0xe9   :  { %342 = vtanh.f32 %v112_v15 }
  0xf1   :  { %v341_v17 = vpop.eup %340 }
  0xf3   :  { %v343_v18 = vpop.eup %342 }
  0xf4   :  { %v117_v19 = vpack.c.bf16 %v343_v18, %v341_v17 }
  0xf6   :  { %316 = vmatmul.mubr.msk.bf16.vlgmr.msra.gmra.mrb[0].mxu1 %vm141_vm2, %v117_v19 }
  0xf7   :  { %323 = vmatprep.mubr.msk.bf16.mxu1 %vm373_vm0, %v372_v1  ;;  %320 = vmatpush3.bf16.msra.mxu1 %v338_v20 }
  0xf8   :  { %321 = vmatprep.subr.bf16.mxu1 %v372_v1 }
  0xfb   :  { %322 = vmatpush3.bf16.msra.mxu1 %v339_v21 }
 0x1c9   :  { %v179_v23 = vpop.f32.mrb[0].mxu1 }
 0x1ca   :  { %v180_v24 = vadd.f32 %v280_v22, %v179_v23  ;;  %v317_v25 = vpop.f32.mrb[1].mxu1 }
 0x1cb   :  { %v182_v26 = vpop.f32.mrb[2].mxu1 }
 0x1cc   :  { %v183_v27 = vadd.f32 %v280_v22, %v182_v26  ;;  %v318_v28 = vpop.f32.mrb[3].mxu1  ;;  %344 = vtanh.f32 %v180_v24 }
 0x1ce   :  { %346 = vtanh.f32 %v183_v27 }
 0x1d6   :  { %v345_v29 = vpop.eup %344 }
 0x1d8   :  { %v347_v30 = vpop.eup %346 }
 0x1d9   :  { %v188_v31 = vpack.c.bf16 %v347_v30, %v345_v29 }
 0x1db   :  { %324 = vmatmul.mubr.msk.bf16.vlgmr.msra.gmra.mrb[4].mxu1 %vm141_vm2, %v188_v31 }
 0x2ae   :  { %v249_v33 = vpop.f32.mrb[4].mxu1 }
 0x2af   :  { %v250_v34 = vadd.f32 %v284_v32, %v249_v33  ;;  %v325_v35 = vpop.f32.mrb[5].mxu1 }
 0x2b0   :  { %v252_v36 = vpop.f32.mrb[6].mxu1 }
 0x2b1   :  { %256 = vst.msk [vmem:[#allocation2] sm:$0xff] %vm141_vm2, %v250_v34  ;;  %v253_v37 = vadd.f32 %v284_v32, %v252_v36  ;;  %v326_v38 = vpop.f32.mrb[7].mxu1 }
 0x2b3   :  { %257 = vst.msk [vmem:[#allocation2 + $0x8] sm:$0xff] %vm141_vm2, %v253_v37 }
 0x2b4   :  { %359 = shalt.err (!%p356_p4)
}
 0x2b5   :  { %s360_s25 = scalar_lea.hbm %s482_s7, 256 }
 0x2b6   :  { %p361_p5 = scmp.ne.s32.totalorder %s482_s7, %s360_s25  ;;  %p364_p6 = scmp.lt.u32.totalorder %s360_s25, %s482_s7 }
 0x2b8   :  { %p366_p7 = pnand %p364_p6, %p361_p5 }
 0x2ba   :  { %369 = shalt.err (!%p366_p7)
}
 0x2bb   :  { %s375_s30 = smov 128   ;;  %s376_s8 = smov 8  }
 0x2bc   :  { %269 = dma.vmem_to_hbm [thread:$0]  %s264_s23, 256, %s482_s7, [#allocation3], %s375_s30, %s375_s30, %s376_s8  }
 0x2bd   :  { %370 = dma.done.wait [#allocation3], 256  }
 0x2be   :  { %371 = vsyncadd [#allocation3], 4294967040 }
 0x2bf   :  { %273 = vsyncpa [#allocation3], 1 }

</bundles_post_ra>
